<compile_context>
chip_gen: v7x
topology: tpu7x:2x2x1
jax: 0.10.0
libtpu: 0.0.40
codegen_flags: <defaults>
</compile_context>

<pallas_src>
import math

import jax
import jax.numpy as jnp
from jax import lax
from jax.experimental import pallas as pl
from jax.experimental.pallas import tpu as pltpu


def _cdiv(a, b):
    return (a + b - 1) // b


def _round_up(a, b):
    return _cdiv(a, b) * b


# ----------------------------------------------------------------------------
# Small-problem path: one grid step over the whole batch.
# ----------------------------------------------------------------------------
def _make_small_kernel(scale):
    def kernel(q_ref, k_ref, v_ref, o_ref):
        # Fold 1/temperature into q (B*S*D muls instead of B*S*S).
        q = q_ref[...] * scale                                    # (B, S, D)
        # scores = q @ k^T without an explicit transpose: contract on D.
        s = lax.dot_general(
            q, k_ref[...],
            dimension_numbers=(((2,), (2,)), ((0,), (0,))),
            preferred_element_type=jnp.float32)                   # (B, S, S) f32
        m = jnp.max(s, axis=-1, keepdims=True)
        p = jnp.exp(s - m)
        l = jnp.sum(p, axis=-1, keepdims=True)
        ctx = lax.dot_general(
            p.astype(v_ref.dtype), v_ref[...],
            dimension_numbers=(((2,), (1,)), ((0,), (0,))),
            preferred_element_type=jnp.float32)                   # (B, S, D) f32
        # Exact division (runs once; approx reciprocal buys nothing here).
        o_ref[...] = (ctx / l).astype(o_ref.dtype)

    return kernel


def _attention_small(q, k, v, scale):
    B, S, D = q.shape
    return pl.pallas_call(
        _make_small_kernel(scale),
        out_shape=jax.ShapeDtypeStruct((B, S, D), q.dtype),
    )(q, k, v)


# ----------------------------------------------------------------------------
# Flash-style path: tiled over (batch, q-tiles, kv-tiles) with online softmax.
# ----------------------------------------------------------------------------
def _make_flash_kernel(scale, tq, tk, d, seq_len, need_kv_mask):
    def kernel(q_ref, k_ref, v_ref, o_ref, q_sc, m_sc, l_sc, acc_sc):
        kv = pl.program_id(2)

        @pl.when(kv == 0)
        def _():
            # The q block is resident across the whole kv loop, so stage the
            # scaled q tile once instead of redoing the (tq, D) multiply per
            # kv step (frees VALU slots, matters most on v5e / small D).
            q_sc[...] = q_ref[...] * scale
            m_sc[...] = jnp.full((tq, 1), -jnp.inf, dtype=jnp.float32)
            l_sc[...] = jnp.zeros((tq, 1), dtype=jnp.float32)
            acc_sc[...] = jnp.zeros((tq, d), dtype=jnp.float32)

        # scores = q_scaled @ k^T without an explicit transpose (contract D of
        # both operands); native-dtype MXU operands, f32 accumulation.
        s = lax.dot_general(
            q_sc[...], k_ref[...],
            dimension_numbers=(((1,), (1,)), ((), ())),
            preferred_element_type=jnp.float32)                   # (tq, tk) f32

        if need_kv_mask:
            # Ragged kv tail: columns past the true sequence length get -inf
            # so they contribute exactly 0 probability.
            col = kv * tk + lax.broadcasted_iota(jnp.int32, (tq, tk), 1)
            s = jnp.where(col < seq_len, s, -jnp.inf)

        m_prev = m_sc[...]
        m_new = jnp.maximum(m_prev, jnp.max(s, axis=-1, keepdims=True))
        alpha = jnp.exp(m_prev - m_new)
        p = jnp.exp(s - m_new)                                    # (tq, tk) f32

        if need_kv_mask:
            # Zero padded V rows so uninitialized edge-block data (possibly
            # NaN/Inf) can never leak into the P @ V accumulation.
            row = kv * tk + lax.broadcasted_iota(jnp.int32, (tk, 1), 0)
            v_tile = jnp.where(row < seq_len, v_ref[...], 0).astype(v_ref.dtype)
        else:
            v_tile = v_ref[...]

        l_sc[...] = alpha * l_sc[...] + jnp.sum(p, axis=-1, keepdims=True)
        acc_sc[...] = alpha * acc_sc[...] + jnp.dot(
            p.astype(v_tile.dtype), v_tile,
            preferred_element_type=jnp.float32)                   # (tq, D) f32
        m_sc[...] = m_new

        @pl.when(kv == pl.num_programs(2) - 1)
        def _():
            # Exact division in the once-per-q-tile finalize: negligible cost,
            # restores ~1e-5-level accuracy vs the approx EUP reciprocal.
            o_ref[...] = (acc_sc[...] / l_sc[...]).astype(o_ref.dtype)

    return kernel


def _pick_tile(s, target, align=128):
    """Tile size for one axis.

    * axis fits in one tile           -> whole axis, rounded up to 8 (sublane)
    * an `align`-multiple divides s   -> largest such divisor <= target
    * otherwise                       -> largest `align` multiple <= target;
                                         the ragged tail is handled by a cdiv
                                         grid plus in-kernel masking.
    """
    if target < align:
        align = 8
    if s <= target:
        return _round_up(s, 8)
    t = (target // align) * align
    while t >= align:
        if s % t == 0:
            return t
        t -= align
    return max((target // align) * align, align)


def _vmem_limit_bytes():
    """Per-generation scoped-VMEM limit: ~75% of physical capacity.

    v5e/v6e (128 MiB) -> 96 MiB, v7x (64 MiB/TC) -> 48 MiB.
    """
    try:
        cap = int(pltpu.get_tpu_info().vmem_capacity_bytes)
    except Exception:  # query unavailable -> assume the smallest (v7x per-TC)
        cap = 64 * 1024 * 1024
    return max(32 * 1024 * 1024, min((cap * 3) // 4, 100 * 1024 * 1024))


def _attention_flash(q, k, v, scale, tq_target, tk_target, kv_buffers):
    B, S, D = q.shape
    tq = _pick_tile(S, tq_target, align=128)
    # tk multiples of 256 fill full v6e/v7x MXU passes when the target allows.
    tk = _pick_tile(S, tk_target, align=128)

    # v7x megacore: make sure both TensorCores get at least one (b, q-tile).
    if B * _cdiv(S, tq) < 2 and tq > 128:
        tq = max(128, _round_up(tq // 2, 128))

    num_q = _cdiv(S, tq)
    num_kv = _cdiv(S, tk)
    need_kv_mask = (num_kv * tk != S)
    grid = (B, num_q, num_kv)

    kv_spec_kwargs = {}
    if kv_buffers and kv_buffers != 2:
        # Optional 3-deep pipelining of the K/V streams (sweep knob).
        kv_spec_kwargs = dict(pipeline_mode=pl.Buffered(kv_buffers))

    return pl.pallas_call(
        _make_flash_kernel(scale, tq, tk, D, S, need_kv_mask),
        out_shape=jax.ShapeDtypeStruct((B, S, D), q.dtype),
        grid_spec=pltpu.PrefetchScalarGridSpec(
            num_scalar_prefetch=0,
            grid=grid,
            in_specs=[
                pl.BlockSpec((None, tq, D), lambda b, qi, ki: (b, qi, 0)),
                pl.BlockSpec((None, tk, D), lambda b, qi, ki: (b, ki, 0),
                             **kv_spec_kwargs),
                pl.BlockSpec((None, tk, D), lambda b, qi, ki: (b, ki, 0),
                             **kv_spec_kwargs),
            ],
            out_specs=pl.BlockSpec((None, tq, D), lambda b, qi, ki: (b, qi, 0)),
            scratch_shapes=[
                pltpu.VMEM((tq, D), q.dtype),       # scaled q, staged at kv==0
                pltpu.VMEM((tq, 1), jnp.float32),   # running max  m
                pltpu.VMEM((tq, 1), jnp.float32),   # running sum  l
                pltpu.VMEM((tq, D), jnp.float32),   # f32 accumulator
            ],
        ),
        compiler_params=pltpu.CompilerParams(
            # batch + q-tiles shard across TensorCores; kv is the reduction.
            dimension_semantics=("parallel", "parallel", "arbitrary"),
            vmem_limit_bytes=_vmem_limit_bytes(),
        ),
    )(q, k, v)


# ----------------------------------------------------------------------------
# Public entry point (matches AttentionBasic(d_k).forward(q, k, v)).
# ----------------------------------------------------------------------------
def attention_basic(q, k, v, *, tq=512, tk=512, kv_buffers=2, force_tiled=False):
    assert q.shape == k.shape == v.shape, "q, k, v must share (B, S, D)"
    B, S, D = q.shape
    scale = 1.0 / math.sqrt(D)  # 1 / temperature

    # Tiny problems: a single grid step over the whole slab beats per-batch /
    # per-tile grid overhead.
    approx_vmem_bytes = 2 * B * S * S * 4 + 4 * B * S * D * q.dtype.itemsize
    if not force_tiled and approx_vmem_bytes <= (4 << 20):
        return _attention_small(q, k, v, scale)
    return _attention_flash(q, k, v, scale, tq, tk, kv_buffers)


def attention_reference(q, k, v):
    """Pure-JAX reference matching the PyTorch module (full f32 matmuls)."""
    d_k = q.shape[-1]
    scores = jnp.einsum("bqd,bkd->bqk", q, k,
                        precision=lax.Precision.HIGHEST) / math.sqrt(d_k)
    attn = jax.nn.softmax(scores, axis=-1)
    return jnp.einsum("bqk,bkd->bqd", attn, v, precision=lax.Precision.HIGHEST)


if __name__ == "__main__":
    # Exact reciprocal in the finalize lets the tolerance come back down from
    # the previous 5e-3; the remaining slack covers online-softmax summation
    # reordering and the MXU's multi-pass f32 matmul.
    TOL = dict(atol=5e-4, rtol=5e-4)

    # --- small-shape path (B=2, seq=8, d_k=32), consistent with the module ---
    key = jax.random.PRNGKey(0)
    kq, kk, kv_ = jax.random.split(key, 3)
    B, S, D = 2, 8, 32
    q = jax.random.normal(kq, (B, S, D), dtype=jnp.float32)
    k = jax.random.normal(kk, (B, S, D), dtype=jnp.float32)
    v = jax.random.normal(kv_, (B, S, D), dtype=jnp.float32)

    out = jax.block_until_ready(attention_basic(q, k, v))
    ref = attention_reference(q, k, v)
    assert out.shape == (B, S, D)
    assert jnp.allclose(out, ref, **TOL), "small-path mismatch vs reference"

    # --- tiled flash path: multiple q and kv tiles (online softmax across kv) ---
    B2, S2, D2 = 2, 256, 128
    k2q, k2k, k2v = jax.random.split(jax.random.PRNGKey(1), 3)
    q2 = jax.random.normal(k2q, (B2, S2, D2), dtype=jnp.float32)
    k2 = jax.random.normal(k2k, (B2, S2, D2), dtype=jnp.float32)
    v2 = jax.random.normal(k2v, (B2, S2, D2), dtype=jnp.float32)

    out2 = jax.block_until_ready(
        attention_basic(q2, k2, v2, tq=128, tk=128, force_tiled=True))
    ref2 = attention_reference(q2, k2, v2)
    assert out2.shape == (B2, S2, D2)
    assert jnp.allclose(out2, ref2, **TOL), "flash-path mismatch vs reference"

    # --- ragged sequence length: cdiv grid + in-kernel -inf masking of the tail ---
    B3, S3, D3 = 2, 200, 64
    k3q, k3k, k3v = jax.random.split(jax.random.PRNGKey(2), 3)
    q3 = jax.random.normal(k3q, (B3, S3, D3), dtype=jnp.float32)
    k3 = jax.random.normal(k3k, (B3, S3, D3), dtype=jnp.float32)
    v3 = jax.random.normal(k3v, (B3, S3, D3), dtype=jnp.float32)

    out3 = jax.block_until_ready(
        attention_basic(q3, k3, v3, tq=128, tk=128, force_tiled=True))
    ref3 = attention_reference(q3, k3, v3)
    assert out3.shape == (B3, S3, D3)
    assert jnp.allclose(out3, ref3, **TOL), "masked-tail mismatch vs reference"

    print("KERNEL_OK")
</pallas_src>

<mosaic_0001>
module attributes {stable_mosaic.version = 11 : i64} {
  func.func @kernel(%arg0: memref<2x8x32xf32, #tpu.memory_space<vmem>>, %arg1: memref<2x8x32xf32, #tpu.memory_space<vmem>>, %arg2: memref<2x8x32xf32, #tpu.memory_space<vmem>>, %arg3: memref<2x8x32xf32, #tpu.memory_space<vmem>>) attributes {dimension_semantics = [], scalar_prefetch = 0 : i64, scratch_operands = 0 : i64, tpu.core_type = #tpu.core_type<tc>} {
    %c0 = arith.constant 0 : index
    %c0_0 = arith.constant 0 : index
    %c0_1 = arith.constant 0 : index
    %0 = vector.load %arg0[%c0, %c0_0, %c0_1] : memref<2x8x32xf32, #tpu.memory_space<vmem>>, vector<2x8x32xf32>
    %cst = arith.constant 0.176776692 : f32
    %1 = vector.broadcast %cst : f32 to vector<2x8x32xf32>
    %2 = arith.mulf %0, %1 : vector<2x8x32xf32>
    %c0_2 = arith.constant 0 : index
    %c0_3 = arith.constant 0 : index
    %c0_4 = arith.constant 0 : index
    %3 = vector.load %arg1[%c0_2, %c0_3, %c0_4] : memref<2x8x32xf32, #tpu.memory_space<vmem>>, vector<2x8x32xf32>
    %cst_5 = arith.constant dense<0.000000e+00> : vector<2x8x8xf32>
    %4 = tpu.matmul %2, %3, %cst_5 {dimension_numbers = #tpu.dot_dimension_numbers<[2], [2], [1], [1], [0, 0, 0, 1, 1, 1], [0], [0]>} : vector<2x8x32xf32>, vector<2x8x32xf32>, vector<2x8x8xf32> -> vector<2x8x8xf32>
    %cst_6 = arith.constant dense<0xFF800000> : vector<2x8xf32>
    %5 = vector.multi_reduction <maximumf>, %4, %cst_6 [2] : vector<2x8x8xf32> to vector<2x8xf32>
    %6 = vector.shape_cast %5 : vector<2x8xf32> to vector<2x8x1xf32>
    %7 = vector.broadcast %6 : vector<2x8x1xf32> to vector<2x8x8xf32>
    %8 = arith.subf %4, %7 : vector<2x8x8xf32>
    %9 = math.exp %8 : vector<2x8x8xf32>
    %cst_7 = arith.constant dense<0.000000e+00> : vector<2x8xf32>
    %10 = vector.multi_reduction <add>, %9, %cst_7 [2] : vector<2x8x8xf32> to vector<2x8xf32>
    %11 = vector.shape_cast %10 : vector<2x8xf32> to vector<2x8x1xf32>
    %c0_8 = arith.constant 0 : index
    %c0_9 = arith.constant 0 : index
    %c0_10 = arith.constant 0 : index
    %12 = vector.load %arg2[%c0_8, %c0_9, %c0_10] : memref<2x8x32xf32, #tpu.memory_space<vmem>>, vector<2x8x32xf32>
    %cst_11 = arith.constant dense<0.000000e+00> : vector<2x8x32xf32>
    %13 = tpu.matmul %9, %12, %cst_11 {dimension_numbers = #tpu.dot_dimension_numbers<[2], [1], [1], [2], [0, 0, 0, 1, 1, 2], [0], [0]>} : vector<2x8x8xf32>, vector<2x8x32xf32>, vector<2x8x32xf32> -> vector<2x8x32xf32>
    %14 = vector.broadcast %11 : vector<2x8x1xf32> to vector<2x8x32xf32>
    %15 = arith.divf %13, %14 : vector<2x8x32xf32>
    %c0_12 = arith.constant 0 : index
    %c0_13 = arith.constant 0 : index
    %c0_14 = arith.constant 0 : index
    %16 = vector.load %arg3[%c0_12, %c0_13, %c0_14] : memref<2x8x32xf32, #tpu.memory_space<vmem>>, vector<2x8x32xf32>
    tpu.vector_store %arg3[%c0_12, %c0_13, %c0_14], %15 {strides = array<i32>} : memref<2x8x32xf32, #tpu.memory_space<vmem>>, vector<2x8x32xf32>,
    return
  }
}

</mosaic_0001>

<bundles_post_ra>
// kernel: tpu_custom_call.1
= control target key start
LH: loop header
LB: loop body
LE: loop exit
PB: predicated region body
PF: predicated region fallthrough
CT: control target
= control target key end

     0   :  { %8 = vsyncpa [#allocation3], 0  ;;  %s661_s0 = inlined_call_operand.hbm [shape: f32[2,8,32], index: 0, kind: input, shape index: {}]   ;;  %s662_s1 = inlined_call_operand.hbm [shape: f32[2,8,32], index: 1, kind: input, shape index: {}]   ;;  %s663_s2 = inlined_call_operand.hbm [shape: f32[2,8,32], index: 2, kind: input, shape index: {}]   ;;  %s664_s3 = inlined_call_operand.hbm [shape: f32[2,8,32], index: 3, kind: output, shape index: {}]  }
   0x1   :  { %9 = vsyncpa [#allocation6], 0 }
   0x2   :  { %10 = vsyncpa [#allocation4], 0  ;;  %s550_s12 = smov [#allocation5]   ;;  %s551_s14 = smov [#allocation2]  }
   0x3   :  { %s28_s13 = sshll.u32 %s550_s12, 4  ;;  %s16_s15 = sshll.u32 %s551_s14, 4  ;;  %s29_s13 = int_to_ptr.vmem [resolvable:$true] %s28_s13  ;;  %s578_s15 = int_to_ptr.vmem [resolvable:$true] %s16_s15 }
   0x4   :  { %s456_s18 = scalar_lea.hbm %s662_s1, 256 }
   0x5   :  { %p457_p0 = scmp.ne.s32.totalorder %s662_s1, %s456_s18  ;;  %p460_p1 = scmp.lt.u32.totalorder %s456_s18, %s662_s1 }
   0x7   :  { %p462_p2 = pnand %p460_p1, %p457_p0 }
   0x9   :  { %465 = shalt.err (!%p462_p2)
}
   0xa   :  { %s466_s23 = scalar_lea.vmem %s29_s13, 256  ;;  %p471_p4 = scmp.lt.s32.totalorder %s29_s13, %s29_s13 }
   0xb   :  { %p467_p3 = scmp.ne.s32.totalorder %s29_s13, %s466_s23  ;;  %p472_p5 = scmp.lt.s32.totalorder %s466_s23, %s466_s23 }
   0xd   :  { %p473_p6 = por %p472_p5, %p471_p4 }
   0xf   :  { %p474_p7 = pnand %p473_p6, %p467_p3 }
  0x11   :  { %477 = shalt.err (!%p474_p7)
}
  0x12   :  { %s552_s24 = smov 128   ;;  %s553_s25 = smov 8  }
  0x13   :  { %34 = dma.hbm_to_vmem [thread:$0]  %s662_s1, 256, %s29_s13, [#allocation6], %s552_s24, %s552_s24, %s553_s25  }
  0x14   :  { %s478_s30 = scalar_lea.hbm %s661_s0, 256 }
  0x15   :  { %p479_p8 = scmp.ne.s32.totalorder %s661_s0, %s478_s30  ;;  %p482_p9 = scmp.lt.u32.totalorder %s478_s30, %s661_s0 }
  0x17   :  { %p484_p10 = pnand %p482_p9, %p479_p8 }
  0x19   :  { %487 = shalt.err (!%p484_p10)
}
  0x1a   :  { %s488_s8 = scalar_lea.vmem %s578_s15, 256  ;;  %p493_p12 = scmp.lt.s32.totalorder %s578_s15, %s578_s15 }
  0x1b   :  { %p489_p11 = scmp.ne.s32.totalorder %s578_s15, %s488_s8  ;;  %p494_p13 = scmp.lt.s32.totalorder %s488_s8, %s488_s8 }
  0x1d   :  { %p495_p0 = por %p494_p13, %p493_p12 }
  0x1f   :  { %p496_p1 = pnand %p495_p0, %p489_p11 }
  0x21   :  { %499 = shalt.err (!%p496_p1)
}
  0x22   :  { %22 = dma.hbm_to_vmem [thread:$0]  %s661_s0, 256, %s578_s15, [#allocation3], %s552_s24, %s552_s24, %s553_s25  }
  0x23   :  { %s554_s10 = smov [#allocation7]   ;;  %s500_s14 = scalar_lea.hbm %s663_s2, 256 }
  0x24   :  { %s40_s11 = sshll.u32 %s554_s10, 4  ;;  %p501_p2 = scmp.ne.s32.totalorder %s663_s2, %s500_s14  ;;  %s41_s11 = int_to_ptr.vmem [resolvable:$true] %s40_s11 }
  0x25   :  { %p504_p3 = scmp.lt.u32.totalorder %s500_s14, %s663_s2 }
  0x27   :  { %p506_p4 = pnand %p504_p3, %p501_p2 }
  0x29   :  { %509 = shalt.err (!%p506_p4)
}
  0x2a   :  { %s510_s20 = scalar_lea.vmem %s41_s11, 256  ;;  %p515_p6 = scmp.lt.s32.totalorder %s41_s11, %s41_s11 }
  0x2b   :  { %p511_p5 = scmp.ne.s32.totalorder %s41_s11, %s510_s20  ;;  %p516_p7 = scmp.lt.s32.totalorder %s510_s20, %s510_s20 }
  0x2d   :  { %p517_p8 = por %p516_p7, %p515_p6 }
  0x2f   :  { %p518_p9 = pnand %p517_p8, %p511_p5 }
  0x31   :  { %521 = shalt.err (!%p518_p9)
}
  0x32   :  { %46 = dma.hbm_to_vmem [thread:$0]  %s663_s2, 256, %s41_s11, [#allocation6], %s552_s24, %s552_s24, %s553_s25  }
  0x33   :  { %544 = dma.done.wait [#allocation3], 256  }
  0x34   :  { %545 = vsyncadd [#allocation3], 4294967040 }
  0x35   :  { %546 = dma.done.wait [#allocation6], 512  }
  0x36   :  { %547 = vsyncadd [#allocation6], 4294966784  ;;  %v555_v0 = vmov 0.0   ;;  %vm556_vm0 = vmmov 0   ;;  %vm62_vm1 = vcmask 261120   ;;  %v60_v1 = vld [vmem:[#allocation5] sm:$0xff] }
  0x37   :  { %420 = vmatprep.subr.mxu0 %v555_v0  ;;  %422 = vmatprep.mubr.msk.f32.mxu0 %vm556_vm0, %v555_v0  ;;  %v56_v2 = vld [vmem:[#allocation2] sm:$0xff]  ;;  %v61_v3 = vld [vmem:[#allocation5 + $0x8] sm:$0xff]  ;;  %v57_v5 = vld [vmem:[#allocation2 + $0x8] sm:$0xff]  ;;  %vm215_vm2 = vcmask 64512   ;;  %s557_s2 = smov [#allocation8]  }
  0x38   :  { %425 = vmatprep.subr.mxu1 %v555_v0  ;;  %427 = vmatprep.mubr.msk.f32.mxu1 %vm556_vm0, %v555_v0  ;;  %v58_v4 = vmul.f32 0.17677669, %v56_v2  ;;  %v59_v6 = vmul.f32 0.17677669, %v57_v5  ;;  %v234_v13 = vld [vmem:[#allocation7] sm:$0xff]  ;;  %v235_v14 = vld [vmem:[#allocation7 + $0x8] sm:$0xff] }
  0x39   :  { %421 = vmatpush3.xpose.msk.msra.mxu0 %vm62_vm1, %v60_v1  ;;  %426 = vmatpush3.xpose.msk.msra.mxu1 %vm62_vm1, %v61_v3  ;;  %s393_s21 = sshll.u32 %s557_s2, 4  ;;  %s394_s21 = int_to_ptr.vmem [resolvable:$true] %s393_s21 }
  0x3a   :  { %430 = vmatprep.subr.mxu0 %v555_v0  ;;  %435 = vmatprep.subr.mxu1 %v555_v0  ;;  %s522_s22 = scalar_lea.vmem %s394_s21, 256  ;;  %p527_p11 = scmp.lt.s32.totalorder %s394_s21, %s394_s21 }
  0x3b   :  { %p523_p10 = scmp.ne.s32.totalorder %s394_s21, %s522_s22  ;;  %p528_p12 = scmp.lt.s32.totalorder %s522_s22, %s522_s22 }
  0x3c   :  { %423 = vmatmul.mubr.msk.f32.vlgmr.msra.gmra.mrb[0].mxu0 %vm62_vm1, %v58_v4  ;;  %428 = vmatmul.mubr.msk.f32.vlgmr.msra.gmra.mrb[0].mxu1 %vm62_vm1, %v59_v6 }
  0x3d   :  { %432 = vmatprep.mubr.msk.f32.mxu0 %vm556_vm0, %v555_v0  ;;  %437 = vmatprep.mubr.msk.f32.mxu1 %vm556_vm0, %v555_v0  ;;  %p529_p13 = por %p528_p12, %p527_p11 }
  0x3e   :  { %431 = vmatpush3.msra.mxu0 %v234_v13  ;;  %436 = vmatpush3.msra.mxu1 %v235_v14 }
  0x3f   :  { %p530_p0 = pnand %p529_p13, %p523_p10 }
 0x10f   :  { %v135_v7 = vpop.f32.mrb[0].mxu0  ;;  %v211_v8 = vpop.f32.mrb[0].mxu1 }
 0x110   :  { %v424_v9 = vpop.f32.mrb[1].mxu0  ;;  %v216_v10 = vsel %vm215_vm2, %v135_v7, -inf  ;;  %v429_v11 = vpop.f32.mrb[1].mxu1  ;;  %v219_v12 = vsel %vm215_vm2, %v211_v8, -inf }
 0x111   :  { %217 = vmax.xlane.f32.xlu0 %v216_v10 }
 0x115   :  { %220 = vmax.xlane.f32.xlu0 %v219_v12 }
 0x19e   :  { %v218_v15 = vpop.xlane.xlu0 %217 }
 0x19f   :  { %v222_v16 = vsub.f32 %v135_v7, %v218_v15 }
 0x1a1   :  { %v224_v17 = vmul.f32 1.442695, %v222_v16 }
 0x1a2   :  { %v221_v18 = vpop.xlane.xlu0 %220 }
 0x1a3   :  { %448 = vpow2.f32 %v224_v17  ;;  %v223_v19 = vsub.f32 %v211_v8, %v221_v18 }
 0x1a5   :  { %v226_v20 = vmul.f32 1.442695, %v223_v19 }
 0x1a7   :  { %450 = vpow2.f32 %v226_v20 }
 0x1ad   :  { %v449_v21 = vpop.eup %448 }
 0x1ae   :  { %433 = vmatmul.mubr.msk.f32.vlgmr.msra.gmra.mrb[2].mxu0 %vm215_vm2, %v449_v21  ;;  %v228_v22 = vsel %vm215_vm2, %v449_v21, 0.0 }
 0x1af   :  { %229 = vadd.xlane.f32.xlu1 %v228_v22 }
 0x1b1   :  { %v451_v23 = vpop.eup %450 }
 0x1b2   :  { %438 = vmatmul.mubr.msk.f32.vlgmr.msra.gmra.mrb[2].mxu1 %vm215_vm2, %v451_v23  ;;  %v231_v24 = vsel %vm215_vm2, %v451_v23, 0.0 }
 0x1b3   :  { %232 = vadd.xlane.f32.xlu1 %v231_v24 }
 0x23c   :  { %v230_v25 = vpop.xlane.xlu1 %229 }
 0x23d   :  { %452 = vrcp.f32 %v230_v25 }
 0x240   :  { %v233_v26 = vpop.xlane.xlu1 %232 }
 0x241   :  { %454 = vrcp.f32 %v233_v26 }
 0x247   :  { %v453_v27 = vpop.eup %452 }
 0x24b   :  { %v455_v31 = vpop.eup %454 }
 0x281   :  { %v305_v28 = vpop.f32.mrb[2].mxu0 }
 0x282   :  { %v383_v29 = vmul.f32 %v453_v27, %v305_v28  ;;  %v434_v30 = vpop.f32.mrb[3].mxu0 }
 0x284   :  { %386 = vst.msk [vmem:[#allocation8] sm:$0xff] %vm62_vm1, %v383_v29 }
 0x285   :  { %v378_v32 = vpop.f32.mrb[2].mxu1 }
 0x286   :  { %v385_v33 = vmul.f32 %v455_v31, %v378_v32  ;;  %v439_v34 = vpop.f32.mrb[3].mxu1 }
 0x288   :  { %387 = vst.msk [vmem:[#allocation8 + $0x8] sm:$0xff] %vm62_vm1, %v385_v33 }
 0x289   :  { %533 = shalt.err (!%p530_p0)
}
 0x28a   :  { %s534_s27 = scalar_lea.hbm %s664_s3, 256 }
 0x28b   :  { %p535_p1 = scmp.ne.s32.totalorder %s664_s3, %s534_s27  ;;  %p538_p2 = scmp.lt.u32.totalorder %s534_s27, %s664_s3 }
 0x28d   :  { %p540_p3 = pnand %p538_p2, %p535_p1 }
 0x28f   :  { %543 = shalt.err (!%p540_p3)
}
 0x290   :  { %399 = dma.vmem_to_hbm [thread:$0]  %s394_s21, 256, %s664_s3, [#allocation4], %s552_s24, %s552_s24, %s553_s25  }
 0x291   :  { %548 = dma.done.wait [#allocation4], 256  }
 0x292   :  { %549 = vsyncadd [#allocation4], 4294967040 }
 0x293   :  { %403 = vsyncpa [#allocation3], 1 }
 0x294   :  { %404 = vsyncpa [#allocation6], 1 }
 0x295   :  { %405 = vsyncpa [#allocation4], 1 }

</bundles_post_ra>
